<compile_context>
chip_gen: v7x
topology: tpu7x:2x2x1
jax: 0.10.0
libtpu: 0.0.40
codegen_flags: <defaults>
</compile_context>

<pallas_src>
import functools
import math

import jax
import jax.numpy as jnp
from jax import lax
from jax.experimental import pallas as pl
from jax.experimental.pallas import tpu as pltpu

ACT_DTYPE = jnp.bfloat16

# ----------------------------------------------------------------------------
# Pallas fused matmul kernel:
#   relu?( ((gate*X) @ W) * scale + bias [* out_mul] [+ residual] )
# ----------------------------------------------------------------------------


def _mm_kernel(*refs, relu, has_gate, has_mul, has_res):
    it = iter(refs)
    x_ref = next(it)
    g_ref = next(it) if has_gate else None
    w_ref = next(it)
    s_ref = next(it)
    b_ref = next(it)
    m_ref = next(it) if has_mul else None
    r_ref = next(it) if has_res else None
    o_ref = next(it)
    acc_ref = next(it)

    @pl.when(pl.program_id(2) == 0)
    def _():
        acc_ref[...] = jnp.zeros_like(acc_ref)

    x = x_ref[...]                                     # bf16 (tm, tk)
    if has_gate:
        # reverse-attention gate fused as a per-row scale (VPU mul, hides
        # under the MXU slot).
        x = x * g_ref[...]                             # bf16 (tm, 1) broadcast
    acc_ref[...] += jnp.dot(x, w_ref[...], preferred_element_type=jnp.float32)

    @pl.when(pl.program_id(2) == pl.num_programs(2) - 1)
    def _():
        y = acc_ref[...] * s_ref[...] + b_ref[...]
        if has_mul:
            y = y * m_ref[...].astype(jnp.float32)
        if has_res:
            y = y + r_ref[...].astype(jnp.float32)
        if relu:
            y = jnp.maximum(y, 0.0)
        o_ref[...] = y.astype(o_ref.dtype)


def _round_up(x, m):
    return (x + m - 1) // m * m


def _pick_tile_m(m):
    """M (sublane) tile: big tiles when they don't add padding beyond 12.5%."""
    if m <= 128:
        return max(8, _round_up(m, 8))
    base = _round_up(m, 128)
    for t in (512, 256):
        if _round_up(m, t) - base <= base // 8:
            return t
    return 128


def _pick_tile_lane(n):
    """K / N (lane) tile: largest of 512/256/128 that divides the padded dim."""
    for t in (512, 256, 128):
        if n % t == 0:
            return t
    return 128


def fused_matmul(x, p, relu=False, gate=None, out_mul=None, residual=None):
    """y[M, N] = relu?( (gate*x)@w * scale + bias [* out_mul] [+ residual] ).

    `p` carries build-time padded bf16 weights (Kp, Np) and f32 scale/bias.
    `gate`     optional (M, 1) per-row multiplier fused into the GEMM.
    `out_mul`  optional (M, N) elementwise multiplier fused in the epilogue.
    `residual` optional (M, N) elementwise addend fused in the epilogue.
    """
    M, K = x.shape
    Kp, Np = p["w"].shape
    N = p["n_out"]
    assert K == p["k_in"], (K, p["k_in"])

    tm = _pick_tile_m(M)
    tk = _pick_tile_lane(Kp)
    tn = _pick_tile_lane(Np)
    Mp = _round_up(M, tm)

    xb = x.astype(ACT_DTYPE)
    if Mp != M or Kp != K:
        xb = jnp.pad(xb, ((0, Mp - M), (0, Kp - K)))

    has_gate = gate is not None
    has_mul = out_mul is not None
    has_res = residual is not None

    def _pad_mn(t):
        t = t.astype(ACT_DTYPE)
        if Mp != M or Np != N:
            t = jnp.pad(t, ((0, Mp - M), (0, Np - N)))
        return t

    args = [xb]
    in_specs = [pl.BlockSpec((tm, tk), lambda i, j, k: (i, k))]
    if has_gate:
        g = gate.astype(ACT_DTYPE)
        if Mp != M:
            g = jnp.pad(g, ((0, Mp - M), (0, 0)))
        args.append(g)
        in_specs.append(pl.BlockSpec((tm, 1), lambda i, j, k: (i, 0)))
    args += [p["w"], p["scale"], p["bias"]]
    in_specs += [
        pl.BlockSpec((tk, tn), lambda i, j, k: (k, j)),
        pl.BlockSpec((1, tn), lambda i, j, k: (0, j)),
        pl.BlockSpec((1, tn), lambda i, j, k: (0, j)),
    ]
    if has_mul:
        args.append(_pad_mn(out_mul))
        # k-invariant index_map -> fetched once per output tile.
        in_specs.append(pl.BlockSpec((tm, tn), lambda i, j, k: (i, j)))
    if has_res:
        args.append(_pad_mn(residual))
        in_specs.append(pl.BlockSpec((tm, tn), lambda i, j, k: (i, j)))

    bytes_accessed = (Mp * Kp * 2) + (Kp * Np * 2) + (Mp * Np * 2) + 8 * Np
    if has_gate:
        bytes_accessed += Mp * 2
    if has_mul:
        bytes_accessed += Mp * Np * 2
    if has_res:
        bytes_accessed += Mp * Np * 2

    out = pl.pallas_call(
        functools.partial(_mm_kernel, relu=relu, has_gate=has_gate,
                          has_mul=has_mul, has_res=has_res),
        out_shape=jax.ShapeDtypeStruct((Mp, Np), ACT_DTYPE),
        grid_spec=pltpu.PrefetchScalarGridSpec(
            num_scalar_prefetch=0,
            grid=(Mp // tm, Np // tn, Kp // tk),
            in_specs=in_specs,
            out_specs=pl.BlockSpec((tm, tn), lambda i, j, k: (i, j)),
            scratch_shapes=[pltpu.VMEM((tm, tn), jnp.float32)],
        ),
        compiler_params=pltpu.CompilerParams(
            dimension_semantics=("parallel", "parallel", "arbitrary")
        ),
        cost_estimate=pl.CostEstimate(
            flops=2 * Mp * Kp * Np,
            transcendentals=0,
            bytes_accessed=bytes_accessed,
        ),
    )(*args)
    if Mp != M or Np != N:
        out = out[:M, :N]
    return out


# ----------------------------------------------------------------------------
# Conv glue (im2col only for k>1) + parameter construction (pre-padded bf16)
# ----------------------------------------------------------------------------

_KEY = [jax.random.PRNGKey(1)]


def _next_key():
    _KEY[0], k = jax.random.split(_KEY[0])
    return k


def make_convbn(cin, cout, k, stride=1, padding=0, dilation=1, has_bn=True):
    kh, kw = (k, k) if isinstance(k, int) else k
    ph, pw = (padding, padding) if isinstance(padding, int) else padding
    dh, dw = (dilation, dilation) if isinstance(dilation, int) else dilation
    fan_in = cin * kh * kw
    K = kh * kw * cin
    w = jax.random.normal(_next_key(), (K, cout), jnp.float32)
    w = w * math.sqrt(2.0 / fan_in)
    eps = 1e-5
    if has_bn:
        gamma = jnp.ones((cout,), jnp.float32)
        beta = jnp.zeros((cout,), jnp.float32)
        mean = jnp.zeros((cout,), jnp.float32)
        var = jnp.ones((cout,), jnp.float32)
        scale = gamma / jnp.sqrt(var + eps)
        bias = beta - mean * scale
    else:
        scale = jnp.ones((cout,), jnp.float32)
        bias = jnp.zeros((cout,), jnp.float32)     # conv bias (deterministic 0)

    # Pad weights / scale / bias ONCE at build time; weights stored as bf16.
    Kp = _round_up(K, 128)
    Np = _round_up(cout, 128)
    wp = jnp.pad(w, ((0, Kp - K), (0, Np - cout))).astype(ACT_DTYPE)
    sp = jnp.pad(scale, (0, Np - cout)).reshape(1, Np).astype(jnp.float32)
    bp = jnp.pad(bias, (0, Np - cout)).reshape(1, Np).astype(jnp.float32)
    return dict(w=wp, scale=sp, bias=bp, k_in=K, n_out=cout,
                kh=kh, kw=kw, stride=stride, ph=ph, pw=pw, dh=dh, dw=dw)


def im2col(x, kh, kw, stride, ph, pw, dh, dw):
    N, H, W, C = x.shape
    xpad = jnp.pad(x, ((0, 0), (ph, ph), (pw, pw), (0, 0)))
    Hp, Wp = H + 2 * ph, W + 2 * pw
    Ho = (Hp - (dh * (kh - 1) + 1)) // stride + 1
    Wo = (Wp - (dw * (kw - 1) + 1)) // stride + 1
    cols = []
    for i in range(kh):
        for j in range(kw):
            patch = xpad[:, i * dh: i * dh + stride * (Ho - 1) + 1: stride,
                            j * dw: j * dw + stride * (Wo - 1) + 1: stride, :]
            cols.append(patch)
    xcol = jnp.concatenate(cols, axis=-1)          # [N, Ho, Wo, kh*kw*C] bf16
    return xcol.reshape(N * Ho * Wo, kh * kw * C), (N, Ho, Wo)


def apply_conv(x, p, relu=False, gate=None, out_mul=None, residual=None):
    """conv (+folded BN) (+epilogue fusions).

    gate     : (N,H,W,1) per-pixel multiplier on the conv INPUT (1x1 only).
    out_mul  : NHWC multiplier on the conv OUTPUT (any kernel size).
    residual : NHWC addend on the conv OUTPUT (any kernel size).
    """
    x = x.astype(ACT_DTYPE)
    if p["kh"] == 1 and p["kw"] == 1 and p["ph"] == 0 and p["pw"] == 0:
        if p["stride"] != 1:
            x = x[:, ::p["stride"], ::p["stride"], :]
        N, Ho, Wo, C = x.shape
        xcol = x.reshape(N * Ho * Wo, C)
    else:
        assert gate is None, "gate fusion only supported for 1x1 convs"
        xcol, (N, Ho, Wo) = im2col(x, p["kh"], p["kw"], p["stride"],
                                   p["ph"], p["pw"], p["dh"], p["dw"])
    g = None if gate is None else gate.reshape(-1, 1)
    m = None if out_mul is None else out_mul.reshape(-1, p["n_out"])
    r = None if residual is None else residual.reshape(-1, p["n_out"])
    y = fused_matmul(xcol, p, relu=relu, gate=g, out_mul=m, residual=r)
    return y.reshape(N, Ho, Wo, p["n_out"])


def maxpool_3x3_s2(x):
    return lax.reduce_window(x, jnp.asarray(-jnp.inf, x.dtype), lax.max,
                             (1, 3, 3, 1), (1, 2, 2, 1),
                             [(0, 0), (1, 1), (1, 1), (0, 0)])


def interpolate_bilinear(x, scale_factor, align_corners=False):
    """Matches torch F.interpolate(mode='bilinear') semantics (no antialias).

    Separable (H then W) formulation: fewer materialized gather copies than
    the 4-corner version.
    """
    N, H, W, C = x.shape
    OH = int(math.floor(H * scale_factor))
    OW = int(math.floor(W * scale_factor))

    def coords(insz, outsz):
        if align_corners:
            if outsz == 1:
                src = jnp.zeros((outsz,), jnp.float32)
            else:
                src = jnp.arange(outsz, dtype=jnp.float32) * (
                    (insz - 1) / (outsz - 1))
        else:
            s = insz / outsz
            src = (jnp.arange(outsz, dtype=jnp.float32) + 0.5) * s - 0.5
            src = jnp.maximum(src, 0.0)
        i0 = jnp.clip(jnp.floor(src).astype(jnp.int32), 0, insz - 1)
        i1 = jnp.minimum(i0 + 1, insz - 1)
        lam = src - i0.astype(jnp.float32)
        return i0, i1, lam

    h0, h1, lh = coords(H, OH)
    w0, w1, lw = coords(W, OW)
    lh = lh[None, :, None, None]
    lw = lw[None, None, :, None]
    xf = x.astype(jnp.float32)
    r0 = jnp.take(xf, h0, axis=1)
    r1 = jnp.take(xf, h1, axis=1)
    rows = r0 * (1 - lh) + r1 * lh
    c0 = jnp.take(rows, w0, axis=2)
    c1 = jnp.take(rows, w1, axis=2)
    out = c0 * (1 - lw) + c1 * lw
    return out.astype(x.dtype)


# ----------------------------------------------------------------------------
# Sub-modules (BasicConv2d = conv + BN; RFB_modified; aggregation; backbone)
# ----------------------------------------------------------------------------


def make_rfb(cin, cout):
    return dict(
        b0=[make_convbn(cin, cout, 1)],
        b1=[make_convbn(cin, cout, 1),
            make_convbn(cout, cout, (1, 3), padding=(0, 1)),
            make_convbn(cout, cout, (3, 1), padding=(1, 0)),
            make_convbn(cout, cout, 3, padding=3, dilation=3)],
        b2=[make_convbn(cin, cout, 1),
            make_convbn(cout, cout, (1, 5), padding=(0, 2)),
            make_convbn(cout, cout, (5, 1), padding=(2, 0)),
            make_convbn(cout, cout, 3, padding=5, dilation=5)],
        b3=[make_convbn(cin, cout, 1),
            make_convbn(cout, cout, (1, 7), padding=(0, 3)),
            make_convbn(cout, cout, (7, 1), padding=(3, 0)),
            make_convbn(cout, cout, 3, padding=7, dilation=7)],
        cat=make_convbn(4 * cout, cout, 3, padding=1),
        res=make_convbn(cin, cout, 1),
    )


def apply_rfb(x, p):
    def seq(z, plist):
        for q in plist:
            z = apply_conv(z, q)
        return z
    x0 = seq(x, p["b0"])
    x1 = seq(x, p["b1"])
    x2 = seq(x, p["b2"])
    x3 = seq(x, p["b3"])
    res = apply_conv(x, p["res"])
    # relu(conv_cat(cat) + conv_res(x)): residual add + relu fused in epilogue.
    return apply_conv(jnp.concatenate([x0, x1, x2, x3], axis=-1),
                      p["cat"], relu=True, residual=res)


def make_aggregation(channel, n_class):
    return dict(
        up1=make_convbn(channel, channel, 3, padding=1),
        up2=make_convbn(channel, channel, 3, padding=1),
        up3=make_convbn(channel, channel, 3, padding=1),
        up4=make_convbn(channel, channel, 3, padding=1),
        up5=make_convbn(2 * channel, 2 * channel, 3, padding=1),
        cat2=make_convbn(2 * channel, 2 * channel, 3, padding=1),
        cat3=make_convbn(3 * channel, 3 * channel, 3, padding=1),
        conv4=make_convbn(3 * channel, 3 * channel, 3, padding=1),
        conv5=make_convbn(3 * channel, n_class, 1, has_bn=False),
    )


def apply_aggregation(p, x1, x2, x3):
    up = lambda t: interpolate_bilinear(t, 2.0, align_corners=True)
    x1_1 = x1
    # elementwise feature multiplies fused into the conv epilogues (out_mul)
    x2_1 = apply_conv(up(x1), p["up1"], out_mul=x2)
    t = apply_conv(up(x2), p["up3"], out_mul=x3)
    x3_1 = apply_conv(up(up(x1)), p["up2"], out_mul=t)
    x2_2 = jnp.concatenate([x2_1, apply_conv(up(x1_1), p["up4"])], axis=-1)
    x2_2 = apply_conv(x2_2, p["cat2"])
    x3_2 = jnp.concatenate([x3_1, apply_conv(up(x2_2), p["up5"])], axis=-1)
    x3_2 = apply_conv(x3_2, p["cat3"])
    x = apply_conv(x3_2, p["conv4"])
    return apply_conv(x, p["conv5"])


def make_bottleneck(cin, cout, stride):
    mid = cout // 4
    return dict(c1=make_convbn(cin, mid, 1),
                c2=make_convbn(mid, mid, 3, stride=stride, padding=1),
                c3=make_convbn(mid, cout, 1),
                down=make_convbn(cin, cout, 1, stride=stride))


def apply_bottleneck(x, p):
    y = apply_conv(x, p["c1"], relu=True)
    y = apply_conv(y, p["c2"], relu=True)
    sc = apply_conv(x, p["down"])
    # relu(conv_c3(y) + shortcut): residual add + relu fused in epilogue.
    return apply_conv(y, p["c3"], relu=True, residual=sc)


def build_params(channel=32, n_class=1):
    return dict(
        # surrogate res2net50_v1b stem (3x conv3x3) + bn1 folded
        stem=dict(c1=make_convbn(3, 32, 3, stride=2, padding=1),
                  c2=make_convbn(32, 32, 3, padding=1),
                  c3=make_convbn(32, 64, 3, padding=1)),
        layer1=make_bottleneck(64, 256, 1),
        layer2=make_bottleneck(256, 512, 2),
        layer3=make_bottleneck(512, 1024, 2),
        layer4=make_bottleneck(1024, 2048, 2),
        rfb2=make_rfb(512, channel),
        rfb3=make_rfb(1024, channel),
        rfb4=make_rfb(2048, channel),
        agg=make_aggregation(channel, n_class),
        ra4_1=make_convbn(2048, 256, 1),
        ra4_2=make_convbn(256 + 64, 256, 5, padding=2),
        ra4_3=make_convbn(256, 256, 5, padding=2),
        ra4_4=make_convbn(256, 256, 5, padding=2),
        ra4_5=make_convbn(256, n_class, 1),
        ra3_1=make_convbn(1024, 64, 1),
        ra3_2=make_convbn(64 + 64, 64, 3, padding=1),
        ra3_3=make_convbn(64, 64, 3, padding=1),
        ra3_4=make_convbn(64, n_class, 3, padding=1),
        ra2_1=make_convbn(512, 64, 1),
        ra2_2=make_convbn(64 + 64, 64, 3, padding=1),
        ra2_3=make_convbn(64, 64, 3, padding=1),
        ra2_4=make_convbn(64, n_class, 3, padding=1),
        edge1=make_convbn(256, 64, 1),
        edge2=make_convbn(64, 64, 3, padding=1),
        edge3=make_convbn(64, 64, 3, padding=1),
        edge4=make_convbn(64, n_class, 3, padding=1),
    )


# ----------------------------------------------------------------------------
# Full MFSNet forward
# ----------------------------------------------------------------------------


def mfsnet_forward(p, x_nchw):
    x = jnp.transpose(x_nchw, (0, 2, 3, 1)).astype(ACT_DTYPE)  # -> NHWC

    # --- backbone (surrogate res2net) ---
    x = apply_conv(x, p["stem"]["c1"], relu=True)
    x = apply_conv(x, p["stem"]["c2"], relu=True)
    x = apply_conv(x, p["stem"]["c3"], relu=True)   # conv1 + bn1 + relu
    x = maxpool_3x3_s2(x)
    x1 = apply_bottleneck(x, p["layer1"])           # 256 ch,  /4
    x2 = apply_bottleneck(x1, p["layer2"])          # 512 ch,  /8
    x3 = apply_bottleneck(x2, p["layer3"])          # 1024 ch, /16
    x4 = apply_bottleneck(x3, p["layer4"])          # 2048 ch, /32

    x2_rfb = apply_rfb(x2, p["rfb2"])
    x3_rfb = apply_rfb(x3, p["rfb3"])
    x4_rfb = apply_rfb(x4, p["rfb4"])

    # --- edge branch ---
    e = apply_conv(x1, p["edge1"])
    e = apply_conv(e, p["edge2"])
    edge_guidance = apply_conv(e, p["edge3"])
    lateral_edge = apply_conv(edge_guidance, p["edge4"])
    lateral_edge = interpolate_bilinear(lateral_edge, 4.0)

    # --- parallel decoder ---
    ra5_feat = apply_aggregation(p["agg"], x4_rfb, x3_rfb, x2_rfb)
    lateral_map_5 = interpolate_bilinear(ra5_feat, 8.0)

    # reverse-attention gate is fused into the following 1x1 conv
    rev_gate = lambda att: (1.0 - jax.nn.sigmoid(att.astype(jnp.float32)))

    # --- RA branch 4 ---
    crop_4 = interpolate_bilinear(ra5_feat, 0.25)
    xr = jnp.concatenate(
        [apply_conv(x4, p["ra4_1"], gate=rev_gate(crop_4)),
         interpolate_bilinear(edge_guidance, 1 / 8)], axis=-1)
    xr = apply_conv(xr, p["ra4_2"], relu=True)
    xr = apply_conv(xr, p["ra4_3"], relu=True)
    xr = apply_conv(xr, p["ra4_4"], relu=True)
    ra4_feat = apply_conv(xr, p["ra4_5"])
    xr = ra4_feat + crop_4
    lateral_map_4 = interpolate_bilinear(xr, 32.0)

    # --- RA branch 3 ---
    crop_3 = interpolate_bilinear(xr, 2.0)
    xr = jnp.concatenate(
        [apply_conv(x3, p["ra3_1"], gate=rev_gate(crop_3)),
         interpolate_bilinear(edge_guidance, 1 / 4)], axis=-1)
    xr = apply_conv(xr, p["ra3_2"], relu=True)
    xr = apply_conv(xr, p["ra3_3"], relu=True)
    ra3_feat = apply_conv(xr, p["ra3_4"])
    xr = ra3_feat + crop_3
    lateral_map_3 = interpolate_bilinear(xr, 16.0)

    # --- RA branch 2 ---
    crop_2 = interpolate_bilinear(xr, 2.0)
    xr = jnp.concatenate(
        [apply_conv(x2, p["ra2_1"], gate=rev_gate(crop_2)),
         interpolate_bilinear(edge_guidance, 1 / 2)], axis=-1)
    xr = apply_conv(xr, p["ra2_2"], relu=True)
    xr = apply_conv(xr, p["ra2_3"], relu=True)
    ra2_feat = apply_conv(xr, p["ra2_4"])
    xr = ra2_feat + crop_2
    lateral_map_2 = interpolate_bilinear(xr, 8.0)

    to_nchw = lambda t: jnp.transpose(t.astype(jnp.float32), (0, 3, 1, 2))
    return (to_nchw(lateral_map_5), to_nchw(lateral_map_4),
            to_nchw(lateral_map_3), to_nchw(lateral_map_2),
            to_nchw(lateral_edge))


# ----------------------------------------------------------------------------


def _selfcheck_fused_matmul():
    """Quick numeric check of the Pallas GEMM kernel against plain jnp."""
    p = make_convbn(6, 70, 1)                       # K=6, N=70 (odd sizes)
    key = jax.random.PRNGKey(3)
    x = jax.random.normal(key, (37, 6), jnp.float32)
    gate = jax.random.uniform(jax.random.PRNGKey(4), (37, 1), jnp.float32)
    res = jax.random.normal(jax.random.PRNGKey(5), (37, 70), jnp.float32)
    mul = jax.random.normal(jax.random.PRNGKey(6), (37, 70), jnp.float32)

    wq = p["w"][:6, :70].astype(jnp.float32)
    sq = p["scale"][0, :70]
    bq = p["bias"][0, :70]
    xq = x.astype(ACT_DTYPE).astype(jnp.float32)

    y = fused_matmul(x, p).astype(jnp.float32)
    ref = xq @ wq * sq + bq
    assert bool(jnp.allclose(y, ref, rtol=2e-2, atol=2e-2)), "GEMM mismatch"

    yg = fused_matmul(x, p, relu=True, gate=gate).astype(jnp.float32)
    gq = gate.astype(ACT_DTYPE).astype(jnp.float32)
    refg = jnp.maximum((xq * gq) @ wq * sq + bq, 0.0)
    assert bool(jnp.allclose(yg, refg, rtol=5e-2, atol=5e-2)), "gated mismatch"

    yr = fused_matmul(x, p, relu=True, residual=res).astype(jnp.float32)
    rq = res.astype(ACT_DTYPE).astype(jnp.float32)
    refr = jnp.maximum(xq @ wq * sq + bq + rq, 0.0)
    assert bool(jnp.allclose(yr, refr, rtol=5e-2, atol=5e-2)), "res mismatch"

    ym = fused_matmul(x, p, out_mul=mul).astype(jnp.float32)
    mq = mul.astype(ACT_DTYPE).astype(jnp.float32)
    refm = (xq @ wq * sq + bq) * mq
    assert bool(jnp.allclose(ym, refm, rtol=5e-2, atol=5e-2)), "mul mismatch"


if __name__ == "__main__":
    _selfcheck_fused_matmul()

    params = build_params(channel=32, n_class=1)
    x = jax.random.normal(jax.random.PRNGKey(0), (2, 3, 64, 64), jnp.float32)

    fwd = jax.jit(lambda inp: mfsnet_forward(params, inp))
    outs = fwd(x)
    outs = jax.block_until_ready(outs)

    expected = (2, 1, 64, 64)
    assert all(o.shape == expected for o in outs), [o.shape for o in outs]
    assert all(bool(jnp.all(jnp.isfinite(o))) for o in outs)

    print("KERNEL_OK")
</pallas_src>

<mosaic_0001>
module attributes {stable_mosaic.version = 11 : i64} {
  func.func @_mm_kernel(%arg0: i32, %arg1: i32, %arg2: i32, %arg3: memref<40x128xbf16, #tpu.memory_space<vmem>>, %arg4: memref<128x128xbf16, #tpu.memory_space<vmem>>, %arg5: memref<1x128xf32, #tpu.memory_space<vmem>>, %arg6: memref<1x128xf32, #tpu.memory_space<vmem>>, %arg7: memref<40x128xbf16, #tpu.memory_space<vmem>>, %arg8: memref<40x128xf32, #tpu.memory_space<vmem>>) attributes {dimension_semantics = [#tpu.dimension_semantics<parallel>, #tpu.dimension_semantics<parallel>, #tpu.dimension_semantics<arbitrary>], iteration_bounds = array<i64: 1, 1, 1>, scalar_prefetch = 0 : i64, scratch_operands = 1 : i64, tpu.core_type = #tpu.core_type<tc>, window_params = [{transform_indices = @transform_0, window_bounds = array<i64: 40, 128>}, {transform_indices = @transform_1, window_bounds = array<i64: 128, 128>}, {transform_indices = @transform_2, window_bounds = array<i64: 1, 128>}, {transform_indices = @transform_3, window_bounds = array<i64: 1, 128>}, {transform_indices = @transform_4, window_bounds = array<i64: 40, 128>}]} {
    %c0_i32 = arith.constant 0 : i32
    %0 = arith.cmpi eq, %arg2, %c0_i32 : i32
    %1 = arith.extui %0 : i1 to i32
    %c0_i32_0 = arith.constant 0 : i32
    %2 = arith.cmpi ne, %1, %c0_i32_0 : i32
    scf.if %2 {
      %cst_10 = arith.constant 0.000000e+00 : f32
      %12 = vector.broadcast %cst_10 : f32 to vector<40x128xf32>
      %c0_11 = arith.constant 0 : index
      %c0_12 = arith.constant 0 : index
      %13 = vector.load %arg8[%c0_11, %c0_12] : memref<40x128xf32, #tpu.memory_space<vmem>>, vector<40x128xf32>
      tpu.vector_store %arg8[%c0_11, %c0_12], %12 {strides = array<i32>} : memref<40x128xf32, #tpu.memory_space<vmem>>, vector<40x128xf32>,
    } else {
    }
    %c0 = arith.constant 0 : index
    %c0_1 = arith.constant 0 : index
    %3 = vector.load %arg3[%c0, %c0_1] : memref<40x128xbf16, #tpu.memory_space<vmem>>, vector<40x128xbf16>
    %c0_2 = arith.constant 0 : index
    %c0_3 = arith.constant 0 : index
    %4 = vector.load %arg8[%c0_2, %c0_3] : memref<40x128xf32, #tpu.memory_space<vmem>>, vector<40x128xf32>
    %c0_4 = arith.constant 0 : index
    %c0_5 = arith.constant 0 : index
    %5 = vector.load %arg4[%c0_4, %c0_5] : memref<128x128xbf16, #tpu.memory_space<vmem>>, vector<128x128xbf16>
    %cst = arith.constant dense<0.000000e+00> : vector<40x128xf32>
    %6 = tpu.matmul %3, %5, %cst {dimension_numbers = #tpu.dot_dimension_numbers<[1], [0], [0], [1], [0, 0, 1, 1], [], []>} : vector<40x128xbf16>, vector<128x128xbf16>, vector<40x128xf32> -> vector<40x128xf32>
    %7 = arith.addf %4, %6 : vector<40x128xf32>
    %c0_6 = arith.constant 0 : index
    %c0_7 = arith.constant 0 : index
    %8 = vector.load %arg8[%c0_6, %c0_7] : memref<40x128xf32, #tpu.memory_space<vmem>>, vector<40x128xf32>
    tpu.vector_store %arg8[%c0_6, %c0_7], %7 {strides = array<i32>} : memref<40x128xf32, #tpu.memory_space<vmem>>, vector<40x128xf32>,
    %c0_i32_8 = arith.constant 0 : i32
    %9 = arith.cmpi eq, %arg2, %c0_i32_8 : i32
    %10 = arith.extui %9 : i1 to i32
    %c0_i32_9 = arith.constant 0 : i32
    %11 = arith.cmpi ne, %10, %c0_i32_9 : i32
    scf.if %11 {
      %c0_10 = arith.constant 0 : index
      %c0_11 = arith.constant 0 : index
      %12 = vector.load %arg8[%c0_10, %c0_11] : memref<40x128xf32, #tpu.memory_space<vmem>>, vector<40x128xf32>
      %c0_12 = arith.constant 0 : index
      %c0_13 = arith.constant 0 : index
      %13 = vector.load %arg5[%c0_12, %c0_13] : memref<1x128xf32, #tpu.memory_space<vmem>>, vector<1x128xf32>
      %14 = vector.broadcast %13 : vector<1x128xf32> to vector<40x128xf32>
      %15 = arith.mulf %12, %14 : vector<40x128xf32>
      %c0_14 = arith.constant 0 : index
      %c0_15 = arith.constant 0 : index
      %16 = vector.load %arg6[%c0_14, %c0_15] : memref<1x128xf32, #tpu.memory_space<vmem>>, vector<1x128xf32>
      %17 = vector.broadcast %16 : vector<1x128xf32> to vector<40x128xf32>
      %18 = arith.addf %15, %17 : vector<40x128xf32>
      %19 = arith.truncf %18 : vector<40x128xf32> to vector<40x128xbf16>
      %c0_16 = arith.constant 0 : index
      %c0_17 = arith.constant 0 : index
      %20 = vector.load %arg7[%c0_16, %c0_17] : memref<40x128xbf16, #tpu.memory_space<vmem>>, vector<40x128xbf16>
      tpu.vector_store %arg7[%c0_16, %c0_17], %19 {strides = array<i32>} : memref<40x128xbf16, #tpu.memory_space<vmem>>, vector<40x128xbf16>,
    } else {
    }
    return
  }
  func.func @transform_0(%arg0: i32, %arg1: i32, %arg2: i32) -> (i32, i32) {
    %c0_i32 = arith.constant 0 : i32
    return %arg0, %arg2 : i32, i32
  }
  func.func @transform_1(%arg0: i32, %arg1: i32, %arg2: i32) -> (i32, i32) {
    %c0_i32 = arith.constant 0 : i32
    return %arg2, %arg1 : i32, i32
  }
  func.func @transform_2(%arg0: i32, %arg1: i32, %arg2: i32) -> (i32, i32) {
    %c0_i32 = arith.constant 0 : i32
    %c0_i32_0 = arith.constant 0 : i32
    return %c0_i32, %arg1 : i32, i32
  }
  func.func @transform_3(%arg0: i32, %arg1: i32, %arg2: i32) -> (i32, i32) {
    %c0_i32 = arith.constant 0 : i32
    %c0_i32_0 = arith.constant 0 : i32
    return %c0_i32, %arg1 : i32, i32
  }
  func.func @transform_4(%arg0: i32, %arg1: i32, %arg2: i32) -> (i32, i32) {
    %c0_i32 = arith.constant 0 : i32
    return %arg0, %arg1 : i32, i32
  }
}

</mosaic_0001>

<bundles_post_ra>
// kernel: tpu_custom_call.1
= control target key start
LH: loop header
LB: loop body
LE: loop exit
PB: predicated region body
PF: predicated region fallthrough
CT: control target
= control target key end

     0   :  { %9 = vsyncpa [#allocation4], 0  ;;  %s553_s0 = inlined_call_operand.hbm [shape: bf16[40,128], index: 0, kind: input, shape index: {}]   ;;  %s554_s1 = inlined_call_operand.hbm [shape: bf16[128,128], index: 1, kind: input, shape index: {}]   ;;  %s555_s2 = inlined_call_operand.vmem [shape: f32[1,128], index: 2, kind: input, shape index: {}]   ;;  %s556_s3 = inlined_call_operand.vmem [shape: f32[1,128], index: 3, kind: input, shape index: {}]   ;;  %s557_s4 = inlined_call_operand.hbm [shape: bf16[40,128], index: 4, kind: output, shape index: {}]  }
   0x1   :  { %10 = vsyncpa [#allocation7], 0 }
   0x2   :  { %11 = vsyncpa [#allocation5], 0  ;;  %s467_s15 = smov [#allocation3]   ;;  %s395_s19 = scalar_lea.hbm %s553_s0, 320 }
   0x3   :  { %s17_s16 = sshll.u32 %s467_s15, 4  ;;  %p396_p0 = scmp.ne.s32.totalorder %s553_s0, %s395_s19  ;;  %s18_s16 = int_to_ptr.vmem [resolvable:$true] %s17_s16 }
   0x4   :  { %p399_p1 = scmp.lt.u32.totalorder %s395_s19, %s553_s0 }
   0x6   :  { %p401_p2 = pnand %p399_p1, %p396_p0 }
   0x8   :  { %404 = shalt.err (!%p401_p2)
}
   0x9   :  { %s405_s24 = scalar_lea.vmem %s18_s16, 320  ;;  %p410_p4 = scmp.lt.s32.totalorder %s18_s16, %s18_s16 }
   0xa   :  { %p406_p3 = scmp.ne.s32.totalorder %s18_s16, %s405_s24  ;;  %p411_p5 = scmp.lt.s32.totalorder %s405_s24, %s405_s24 }
   0xc   :  { %p412_p6 = por %p411_p5, %p410_p4 }
   0xe   :  { %p413_p7 = pnand %p412_p6, %p406_p3 }
  0x10   :  { %416 = shalt.err (!%p413_p7)
}
  0x11   :  { %s468_s25 = smov 64   ;;  %s469_s26 = smov 4  }
  0x12   :  { %23 = dma.hbm_to_vmem [thread:$0]  %s553_s0, 320, %s18_s16, [#allocation4], %s468_s25, %s468_s25, %s469_s26  }
  0x13   :  { %s470_s29 = smov [#allocation6]   ;;  %s417_s7 = scalar_lea.hbm %s554_s1, 1024 }
  0x14   :  { %s29_s30 = sshll.u32 %s470_s29, 4  ;;  %p418_p8 = scmp.ne.s32.totalorder %s554_s1, %s417_s7  ;;  %s30_s30 = int_to_ptr.vmem [resolvable:$true] %s29_s30 }
  0x15   :  { %p421_p9 = scmp.lt.u32.totalorder %s417_s7, %s554_s1 }
  0x17   :  { %p423_p10 = pnand %p421_p9, %p418_p8 }
  0x19   :  { %426 = shalt.err (!%p423_p10)
}
  0x1a   :  { %s427_s12 = scalar_lea.vmem %s30_s30, 1024  ;;  %p432_p12 = scmp.lt.s32.totalorder %s30_s30, %s30_s30 }
  0x1b   :  { %p428_p11 = scmp.ne.s32.totalorder %s30_s30, %s427_s12  ;;  %p433_p13 = scmp.lt.s32.totalorder %s427_s12, %s427_s12 }
  0x1d   :  { %p434_p0 = por %p433_p13, %p432_p12 }
  0x1f   :  { %p435_p1 = pnand %p434_p0, %p428_p11 }
  0x21   :  { %438 = shalt.err (!%p435_p1)
}
  0x22   :  { %35 = dma.hbm_to_vmem [thread:$0]  %s554_s1, 1024, %s30_s30, [#allocation7], %s468_s25, %s468_s25, %s469_s26  }
  0x23   :  { %461 = dma.done.wait [#allocation4], 320  }
  0x24   :  { %462 = vsyncadd [#allocation4], 4294966976 }
  0x25   :  { %463 = dma.done.wait [#allocation7], 1024  }
  0x26   :  { %464 = vsyncadd [#allocation7], 4294966272  ;;  %v471_v0 = vmov 0.0   ;;  %vm472_vm0 = vmmov 0   ;;  %v384_v1 = vld [vmem:[#allocation6] sm:$0xff]   ;;  %v385_v2 = vld [vmem:[#allocation6 + $0x8] sm:$0xff]  }
  0x27   :  { %361 = vmatprep.subr.bf16.mxu1 %v471_v0  ;;  %333 = vmatprep.subr.bf16.mxu0 %v471_v0  ;;  %v386_v3 = vld [vmem:[#allocation6 + $0x10] sm:$0xff]   ;;  %v387_v4 = vld [vmem:[#allocation6 + $0x18] sm:$0xff]   ;;  %v388_v5 = vld [vmem:[#allocation6 + $0x20] sm:$0xff]  }
  0x28   :  { %353 = vmatprep.mubr.msk.bf16.mxu1 %vm472_vm0, %v471_v0  ;;  %349 = vmatprep.mubr.msk.bf16.mxu0 %vm472_vm0, %v471_v0  ;;  %v389_v6 = vld [vmem:[#allocation6 + $0x28] sm:$0xff]   ;;  %v390_v7 = vld [vmem:[#allocation6 + $0x30] sm:$0xff]   ;;  %v391_v8 = vld [vmem:[#allocation6 + $0x38] sm:$0xff]  }
  0x29   :  { %369 = vmatpush3.bf16.msra.mxu1 %v384_v1  ;;  %334 = vmatpush3.bf16.msra.mxu0 %v384_v1  ;;  %v392_v9 = vld [vmem:[#allocation3 + $0x8] sm:$0xff]   ;;  %v393_v10 = vld [vmem:[#allocation3] sm:$0xff]   ;;  %v394_v11 = vld [vmem:[#allocation3 + $0x10] ss:$0 sps:$4 sm:$0xff]  }
  0x2a   :  { %362 = vmatprep.subr.bf16.mxu1 %v471_v0  ;;  %335 = vmatprep.subr.bf16.mxu0 %v471_v0  ;;  %v299_v12 = vld [vmem:[%s555_s2] ss:$0 sm:$0xff]  ;;  %s473_s2 = smov [#allocation8]  }
  0x2b   :  { %v300_v19 = vld [vmem:[%s556_s3] ss:$0 sm:$0xff]  ;;  %s275_s3 = sshll.u32 %s473_s2, 4  ;;  %s276_s3 = int_to_ptr.vmem [resolvable:$true] %s275_s3 }
  0x2c   :  { %s439_s17 = scalar_lea.vmem %s276_s3, 320  ;;  %p444_p3 = scmp.lt.s32.totalorder %s276_s3, %s276_s3 }
  0x2d   :  { %370 = vmatpush3.bf16.msra.mxu1 %v385_v2  ;;  %336 = vmatpush3.bf16.msra.mxu0 %v385_v2  ;;  %p440_p2 = scmp.ne.s32.totalorder %s276_s3, %s439_s17  ;;  %p445_p4 = scmp.lt.s32.totalorder %s439_s17, %s439_s17 }
  0x2e   :  { %363 = vmatprep.subr.bf16.mxu1 %v471_v0  ;;  %337 = vmatprep.subr.bf16.mxu0 %v471_v0 }
  0x2f   :  { %p446_p5 = por %p445_p4, %p444_p3 }
  0x31   :  { %371 = vmatpush3.bf16.msra.mxu1 %v386_v3  ;;  %338 = vmatpush3.bf16.msra.mxu0 %v386_v3  ;;  %p447_p6 = pnand %p446_p5, %p440_p2 }
  0x32   :  { %364 = vmatprep.subr.bf16.mxu1 %v471_v0  ;;  %339 = vmatprep.subr.bf16.mxu0 %v471_v0 }
  0x35   :  { %372 = vmatpush3.bf16.msra.mxu1 %v387_v4  ;;  %340 = vmatpush3.bf16.msra.mxu0 %v387_v4 }
  0x36   :  { %365 = vmatprep.subr.bf16.mxu1 %v471_v0  ;;  %341 = vmatprep.subr.bf16.mxu0 %v471_v0 }
  0x39   :  { %373 = vmatpush3.bf16.msra.mxu1 %v388_v5  ;;  %342 = vmatpush3.bf16.msra.mxu0 %v388_v5 }
  0x3a   :  { %366 = vmatprep.subr.bf16.mxu1 %v471_v0  ;;  %343 = vmatprep.subr.bf16.mxu0 %v471_v0 }
  0x3d   :  { %374 = vmatpush3.bf16.msra.mxu1 %v389_v6  ;;  %344 = vmatpush3.bf16.msra.mxu0 %v389_v6 }
  0x3e   :  { %367 = vmatprep.subr.bf16.mxu1 %v471_v0  ;;  %345 = vmatprep.subr.bf16.mxu0 %v471_v0 }
  0x41   :  { %375 = vmatpush3.bf16.msra.mxu1 %v390_v7  ;;  %346 = vmatpush3.bf16.msra.mxu0 %v390_v7 }
  0x42   :  { %368 = vmatprep.subr.bf16.mxu1 %v471_v0  ;;  %347 = vmatprep.subr.bf16.mxu0 %v471_v0 }
  0x45   :  { %376 = vmatpush3.bf16.msra.mxu1 %v391_v8  ;;  %348 = vmatpush3.bf16.msra.mxu0 %v391_v8 }
  0x48   :  { %354 = vmatmul.mubr.bf16.vlgmr.msra.gmra.mrb[0].mxu1 %v392_v9  ;;  %350 = vmatmul.mubr.bf16.vlgmr.msra.gmra.mrb[0].mxu0 %v393_v10 }
  0x49   :  { %357 = vmatprep.mubr.msk.bf16.mxu1 %vm472_vm0, %v471_v0 }
  0x50   :  { %358 = vmatmul.mubr.bf16.gmra.mrb[4].mxu1 %v394_v11 }
 0x11b   :  { %v188_v13 = vpop.f32.mrb[0].mxu1  ;;  %v180_v14 = vpop.f32.mrb[0].mxu0 }
 0x11c   :  { %v229_v15 = vmul.f32 %v299_v12, %v188_v13  ;;  %v355_v16 = vpop.f32.mrb[1].mxu1  ;;  %v227_v17 = vmul.f32 %v299_v12, %v180_v14  ;;  %v351_v18 = vpop.f32.mrb[1].mxu0 }
 0x11d   :  { %v191_v20 = vpop.f32.mrb[2].mxu1  ;;  %v183_v21 = vpop.f32.mrb[2].mxu0 }
 0x11e   :  { %v230_v22 = vmul.f32 %v299_v12, %v191_v20  ;;  %v239_v23 = vadd.f32 %v300_v19, %v227_v17  ;;  %v356_v24 = vpop.f32.mrb[3].mxu1  ;;  %v228_v25 = vmul.f32 %v299_v12, %v183_v21  ;;  %v352_v26 = vpop.f32.mrb[3].mxu0  ;;  %v241_v27 = vadd.f32 %v300_v19, %v229_v15 }
 0x120   :  { %v242_v28 = vadd.f32 %v300_v19, %v230_v22  ;;  %v240_v29 = vadd.f32 %v300_v19, %v228_v25 }
 0x122   :  { %v319_v30 = vpack.c.bf16 %v242_v28, %v241_v27  ;;  %v314_v31 = vpack.c.bf16 %v240_v29, %v239_v23 }
 0x123   :  { %v196_v32 = vpop.f32.mrb[4].mxu1 }
 0x124   :  { %321 = vst [vmem:[#allocation8 + $0x8] sm:$0xff] %v319_v30   ;;  %315 = vst [vmem:[#allocation8] sm:$0xff] %v314_v31   ;;  %v231_v33 = vmul.f32 %v299_v12, %v196_v32  ;;  %v359_v34 = vpop.f32.mrb[5].mxu1 }
 0x125   :  { %v199_v35 = vpop.f32.mrb[6].mxu1 }
 0x126   :  { %v243_v36 = vadd.f32 %v300_v19, %v231_v33  ;;  %v360_v37 = vpop.f32.mrb[7].mxu1 }
 0x128   :  { %v310_v38 = vpack.c.bf16 %v243_v36, %v243_v36 }
 0x12a   :  { %269 = vst [vmem:[#allocation8 + $0x10] sm:$0xf] %v310_v38 }
 0x12b   :  { %450 = shalt.err (!%p447_p6)
}
 0x12c   :  { %s451_s20 = scalar_lea.hbm %s557_s4, 320 }
 0x12d   :  { %p452_p7 = scmp.ne.s32.totalorder %s557_s4, %s451_s20  ;;  %p455_p8 = scmp.lt.u32.totalorder %s451_s20, %s557_s4 }
 0x12f   :  { %p457_p9 = pnand %p455_p8, %p452_p7 }
 0x131   :  { %460 = shalt.err (!%p457_p9)
}
 0x132   :  { %281 = dma.vmem_to_hbm [thread:$0]  %s276_s3, 320, %s557_s4, [#allocation5], %s468_s25, %s468_s25, %s469_s26  }
 0x133   :  { %465 = dma.done.wait [#allocation5], 320  }
 0x134   :  { %466 = vsyncadd [#allocation5], 4294966976 }
 0x135   :  { %285 = vsyncpa [#allocation4], 1 }
 0x136   :  { %286 = vsyncpa [#allocation7], 1 }
 0x137   :  { %287 = vsyncpa [#allocation5], 1 }

</bundles_post_ra>
